<compile_context>
chip_gen: v7x
topology: tpu7x:2x2x1
jax: 0.10.0
libtpu: 0.0.40
codegen_flags: <defaults>
</compile_context>

<pallas_src>
import jax
import jax.numpy as jnp
from jax import lax
from jax.experimental import pallas as pl
from jax.experimental.pallas import tpu as pltpu


def lstm_recurrence_kernel(gx_ref, whh_ref, len_ref, out_ref, h_scr, c_scr):
    """Recurrent phase of the LSTM; the input projection (+bias) is precomputed.

    gx_ref:  [Tt, Bt, 4*Hp] f32  precomputed x @ W_ih^T + b (gate order i,f,o,g)
    whh_ref: [Hp, 4*Hp]     f32  hidden->hidden weights (transposed, i,f,o,g)
    len_ref: [Bt, 1]        i32  sequence lengths
    out_ref: [Bt, Hp]       f32  h at the last unpadded step per batch row
    h_scr:   [Bt, Hp]       f32  hidden state (persists across time chunks)
    c_scr:   [Bt, Hp]       f32  cell state   (persists across time chunks)
    """
    Tt = gx_ref.shape[0]
    Bt, Hp = h_scr.shape
    chunk = pl.program_id(1)

    @pl.when(chunk == 0)
    def _():
        h_scr[...] = jnp.zeros_like(h_scr)
        c_scr[...] = jnp.zeros_like(c_scr)

    # Loop-invariant work hoisted out of the serial recurrence (JAX does not
    # CSE broadcast_in_dim, so do the lane-broadcast of the lengths once).
    len_b = jnp.broadcast_to(len_ref[...], (Bt, Hp))      # [Bt, Hp] int32
    t0 = chunk * Tt

    # TODO(synk): if bundle dumps show W_hh being re-pushed into the MXU every
    # timestep (M=Bt is tiny), switch to explicit pltpu.matmul_push_rhs once
    # per chunk + matmul_acc_lhs/matmul_pop per step.
    # TODO(synk): on v6e/v7x the sigmoid/tanh could run in bf16 on the EUP for
    # ~2x transcendental throughput; kept f32 here for portability/precision.
    def step(t, carry):
        # Serial-dependency work is only h @ W_hh (f32 MXU) + nonlinearities.
        gates = gx_ref[t] + jnp.dot(h_scr[...], whh_ref[...],
                                    preferred_element_type=jnp.float32)  # [Bt,4Hp]
        # Gate layout (i, f, o, g): one wide sigmoid over the first 3*Hp lanes.
        sig = jax.nn.sigmoid(gates[:, 0:3 * Hp])
        i_g = sig[:, 0 * Hp:1 * Hp]
        f_g = sig[:, 1 * Hp:2 * Hp]
        o_g = sig[:, 2 * Hp:3 * Hp]
        g_g = jnp.tanh(gates[:, 3 * Hp:4 * Hp])
        c_new = f_g * c_scr[...] + i_g * g_g
        h_new = o_g * jnp.tanh(c_new)
        # Packed-sequence semantics: state stops updating past each seq length.
        valid = (t0 + t) < len_b
        c_scr[...] = jnp.where(valid, c_new, c_scr[...])
        h_scr[...] = jnp.where(valid, h_new, h_scr[...])
        return carry

    lax.fori_loop(0, Tt, step, 0, unroll=4)

    @pl.when(chunk == pl.num_programs(1) - 1)
    def _():
        out_ref[...] = h_scr[...]


def _round_up(x, m):
    return (x + m - 1) // m * m


def _resident_spec(block_shape, index_map):
    """BlockSpec for a loop-invariant operand; single-buffered when supported."""
    try:
        return pl.BlockSpec(block_shape, index_map, pipeline_mode=pl.Buffered(1))
    except Exception:  # older/newer API without pipeline_mode / Buffered(1)
        return pl.BlockSpec(block_shape, index_map)


def _vmem_limit_bytes():
    """~75% of physical VMEM (96 MiB on v5e/v6e, 48 MiB on v7x); safe fallback."""
    try:
        cap = pltpu.get_tpu_info().vmem_capacity_bytes
        if cap:
            return int(cap * 3 // 4)
    except Exception:
        pass
    return 64 * 1024 * 1024


def attentive_rnn_forward(x, lengths, w_ih, w_hh, b_ih, b_hh, *,
                          time_chunk=None, batch_tiles=None):
    """AttentiveRNN.forward (lstm, unidirectional, attention=False, eval) -> [B, H]."""
    # TODO(synk): dropout (p=0.1) is identity in eval mode; training-mode
    # dropout masks are not implemented.
    B, T, D = x.shape
    H = w_hh.shape[1]
    Hp = _round_up(max(H, 1), 128)     # lane-aligned hidden size

    # Batch tiling: sublane aligned; >=2 tiles once B is large enough so the
    # "parallel" batch grid axis can be split across v7x's two TensorCores.
    B8 = _round_up(max(B, 1), 8)
    if batch_tiles is None:
        batch_tiles = 2 if B8 >= 16 else 1
    Bt = _round_up(-(-B8 // batch_tiles), 8)   # per-tile batch (multiple of 8)
    Bp = Bt * batch_tiles                      # padded batch

    # --- Re-order PyTorch gate blocks (i, f, g, o) -> (i, f, o, g) and pad
    # each gate block H -> Hp so gate slices land on 128-lane boundaries. ---
    def gate_rows(w):
        return w[0 * H:1 * H], w[1 * H:2 * H], w[2 * H:3 * H], w[3 * H:4 * H]

    wi_i, wi_f, wi_g, wi_o = gate_rows(w_ih)          # each [H, D]
    wh_i, wh_f, wh_g, wh_o = gate_rows(w_hh)          # each [H, H]
    b = (b_ih + b_hh)
    b_i, b_f, b_g, b_o = b[0 * H:H], b[H:2 * H], b[2 * H:3 * H], b[3 * H:4 * H]

    def ih_block(w_g):                                # [H, D] -> [D, Hp]
        return jnp.pad(w_g.T, ((0, 0), (0, Hp - H)))

    def hh_block(w_g):                                # [H, H] -> [Hp, Hp]
        return jnp.pad(w_g.T, ((0, Hp - H), (0, Hp - H)))

    def b_block(b_g):                                 # [H] -> [Hp]
        return jnp.pad(b_g, (0, Hp - H))

    w_ih_packed = jnp.concatenate(
        [ih_block(wi_i), ih_block(wi_f), ih_block(wi_o), ih_block(wi_g)], axis=1)  # [D, 4Hp]
    w_hh_packed = jnp.concatenate(
        [hh_block(wh_i), hh_block(wh_f), hh_block(wh_o), hh_block(wh_g)], axis=1)  # [Hp, 4Hp]
    bias_packed = jnp.concatenate(
        [b_block(b_i), b_block(b_f), b_block(b_o), b_block(b_g)])                  # [4Hp]

    # --- Hoisted input projection: one big matmul over all timesteps, with the
    # bias folded in via a ones-column (guaranteed to fuse, no extra HBM pass).
    # einsum output is already time-major [T, Bp, 4Hp] (no separate transpose). ---
    x_aug = jnp.concatenate(
        [x.astype(jnp.float32), jnp.ones((B, T, 1), jnp.float32)], axis=-1)  # [B,T,D+1]
    x_aug = jnp.pad(x_aug, ((0, Bp - B), (0, 0), (0, 0)))                    # [Bp,T,D+1]
    w_aug = jnp.concatenate(
        [w_ih_packed.astype(jnp.float32), bias_packed.astype(jnp.float32)[None, :]],
        axis=0)                                                              # [D+1,4Hp]
    gates_x = jnp.einsum('btd,dg->tbg', x_aug, w_aug,
                         preferred_element_type=jnp.float32)                 # [T,Bp,4Hp]

    # --- Time-chunked grid so BlockSpec double-buffers the gate-stream DMAs.
    # ~4 MiB of f32 gates per buffer, at least 8 timesteps per chunk. ---
    if time_chunk is None:
        per_step_bytes = Bp * 4 * Hp * 4
        time_chunk = max(8, (4 << 20) // max(per_step_bytes, 1))
        time_chunk = max(1, min(T, time_chunk))
    Tp = _round_up(T, time_chunk)
    if Tp != T:
        gates_x = jnp.pad(gates_x, ((0, Tp - T), (0, 0), (0, 0)))
    num_chunks = Tp // time_chunk

    lens = jnp.pad(lengths.astype(jnp.int32), (0, Bp - B)).reshape(Bp, 1)

    out = pl.pallas_call(
        lstm_recurrence_kernel,
        out_shape=jax.ShapeDtypeStruct((Bp, Hp), jnp.float32),
        grid=(batch_tiles, num_chunks),
        in_specs=[
            # streamed gate chunks (double-buffered by default)
            pl.BlockSpec((time_chunk, Bt, 4 * Hp), lambda bt, i: (i, bt, 0)),
            # loop-invariant operands: single-buffered (no wasted VMEM copy)
            _resident_spec((Hp, 4 * Hp), lambda bt, i: (0, 0)),
            _resident_spec((Bt, 1), lambda bt, i: (bt, 0)),
        ],
        out_specs=pl.BlockSpec((Bt, Hp), lambda bt, i: (bt, 0)),
        scratch_shapes=[
            pltpu.VMEM((Bt, Hp), jnp.float32),   # h state
            pltpu.VMEM((Bt, Hp), jnp.float32),   # c state
        ],
        compiler_params=pltpu.CompilerParams(
            # batch tiles are independent (megacore-parallel); time is serial.
            dimension_semantics=("parallel", "arbitrary"),
            vmem_limit_bytes=_vmem_limit_bytes(),
        ),
    )(gates_x, w_hh_packed.astype(jnp.float32), lens)

    return out[:B, :H]


def reference_forward(x, lengths, w_ih, w_hh, b_ih, b_hh):
    """Pure-JAX f32 reference of the LSTM-last-unpadded-hidden computation."""
    B, T, D = x.shape
    H = w_hh.shape[1]
    h = jnp.zeros((B, H), jnp.float32)
    c = jnp.zeros((B, H), jnp.float32)
    for t in range(T):
        gates = x[:, t, :] @ w_ih.T + h @ w_hh.T + b_ih + b_hh
        i_g = jax.nn.sigmoid(gates[:, :H])
        f_g = jax.nn.sigmoid(gates[:, H:2 * H])
        g_g = jnp.tanh(gates[:, 2 * H:3 * H])
        o_g = jax.nn.sigmoid(gates[:, 3 * H:])
        c_new = f_g * c + i_g * g_g
        h_new = o_g * jnp.tanh(c_new)
        valid = (t < lengths)[:, None]
        c = jnp.where(valid, c_new, c)
        h = jnp.where(valid, h_new, h)
    return h


if __name__ == "__main__":
    B, T, D, H = 2, 8, 16, 32

    key = jax.random.PRNGKey(0)
    k_x, k_wih, k_whh, k_bih, k_bhh = jax.random.split(key, 5)

    # Deterministic parameter init (PyTorch-style U(-1/sqrt(H), 1/sqrt(H))).
    scale = 1.0 / jnp.sqrt(jnp.float32(H))
    w_ih = jax.random.uniform(k_wih, (4 * H, D), jnp.float32, -scale, scale)
    w_hh = jax.random.uniform(k_whh, (4 * H, H), jnp.float32, -scale, scale)
    b_ih = jax.random.uniform(k_bih, (4 * H,), jnp.float32, -scale, scale)
    b_hh = jax.random.uniform(k_bhh, (4 * H,), jnp.float32, -scale, scale)

    x = jax.random.normal(k_x, (B, T, D), jnp.float32)
    lengths = jnp.array([T, 5], dtype=jnp.int32)   # variable-length sequences

    # time_chunk=4 forces a 2-step time grid to exercise the pipelined path.
    fwd = jax.jit(attentive_rnn_forward,
                  static_argnames=("time_chunk", "batch_tiles"))
    out = fwd(x, lengths, w_ih, w_hh, b_ih, b_hh, time_chunk=4)
    out = jax.block_until_ready(out)

    ref = reference_forward(x, lengths, w_ih, w_hh, b_ih, b_hh)
    assert out.shape == (B, H)
    # Full-f32 pipeline: tight tolerance vs. the f32 reference.
    assert jnp.allclose(out, ref, atol=1e-4, rtol=1e-4), "mismatch vs reference"

    print("KERNEL_OK")
</pallas_src>

<mosaic_0001>
module attributes {stable_mosaic.version = 11 : i64} {
  func.func @lstm_recurrence_kernel(%arg0: i32, %arg1: i32, %arg2: memref<4x8x512xf32, #tpu.memory_space<vmem>>, %arg3: memref<128x512xf32, #tpu.memory_space<vmem>>, %arg4: memref<8x1xi32, #tpu.memory_space<vmem>>, %arg5: memref<8x128xf32, #tpu.memory_space<vmem>>, %arg6: memref<8x128xf32, #tpu.memory_space<vmem>>, %arg7: memref<8x128xf32, #tpu.memory_space<vmem>>) attributes {dimension_semantics = [#tpu.dimension_semantics<parallel>, #tpu.dimension_semantics<arbitrary>], iteration_bounds = array<i64: 1, 2>, scalar_prefetch = 0 : i64, scratch_operands = 2 : i64, tpu.core_type = #tpu.core_type<tc>, window_params = [{transform_indices = @transform_0, window_bounds = array<i64: 4, 8, 512>}, {pipeline_mode = #tpu.pipeline_mode<synchronous>, transform_indices = @transform_1, window_bounds = array<i64: 128, 512>}, {pipeline_mode = #tpu.pipeline_mode<synchronous>, transform_indices = @transform_2, window_bounds = array<i64: 8, 1>}, {transform_indices = @transform_3, window_bounds = array<i64: 8, 128>}]} {
    %c0_i32 = arith.constant 0 : i32
    %0 = arith.cmpi eq, %arg1, %c0_i32 : i32
    %1 = arith.extui %0 : i1 to i32
    %c0_i32_0 = arith.constant 0 : i32
    %2 = arith.cmpi ne, %1, %c0_i32_0 : i32
    scf.if %2 {
      %cst_77 = arith.constant 0.000000e+00 : f32
      %142 = vector.broadcast %cst_77 : f32 to vector<8x128xf32>
      %c0_78 = arith.constant 0 : index
      %c0_79 = arith.constant 0 : index
      %143 = vector.load %arg6[%c0_78, %c0_79] : memref<8x128xf32, #tpu.memory_space<vmem>>, vector<8x128xf32>
      tpu.vector_store %arg6[%c0_78, %c0_79], %142 {strides = array<i32>} : memref<8x128xf32, #tpu.memory_space<vmem>>, vector<8x128xf32>,
      %cst_80 = arith.constant 0.000000e+00 : f32
      %144 = vector.broadcast %cst_80 : f32 to vector<8x128xf32>
      %c0_81 = arith.constant 0 : index
      %c0_82 = arith.constant 0 : index
      %145 = vector.load %arg7[%c0_81, %c0_82] : memref<8x128xf32, #tpu.memory_space<vmem>>, vector<8x128xf32>
      tpu.vector_store %arg7[%c0_81, %c0_82], %144 {strides = array<i32>} : memref<8x128xf32, #tpu.memory_space<vmem>>, vector<8x128xf32>,
    } else {
    }
    %c0 = arith.constant 0 : index
    %c0_1 = arith.constant 0 : index
    %3 = vector.load %arg4[%c0, %c0_1] : memref<8x1xi32, #tpu.memory_space<vmem>>, vector<8x1xi32>
    %4 = vector.shape_cast %3 : vector<8x1xi32> to vector<8x1xi32>
    %5 = vector.broadcast %4 : vector<8x1xi32> to vector<8x128xi32>
    %c4_i32 = arith.constant 4 : i32
    %6 = arith.muli %arg1, %c4_i32 : i32
    %c0_i32_2 = arith.constant 0 : i32
    %7 = arith.index_cast %c0_i32_2 : i32 to index
    %c0_3 = arith.constant 0 : index
    %c0_4 = arith.constant 0 : index
    %8 = vector.load %arg2[%7, %c0_3, %c0_4] : memref<4x8x512xf32, #tpu.memory_space<vmem>>, vector<1x8x512xf32>
    %9 = vector.shape_cast %8 : vector<1x8x512xf32> to vector<8x512xf32>
    %c0_5 = arith.constant 0 : index
    %c0_6 = arith.constant 0 : index
    %10 = vector.load %arg6[%c0_5, %c0_6] : memref<8x128xf32, #tpu.memory_space<vmem>>, vector<8x128xf32>
    %c0_7 = arith.constant 0 : index
    %c0_8 = arith.constant 0 : index
    %11 = vector.load %arg3[%c0_7, %c0_8] : memref<128x512xf32, #tpu.memory_space<vmem>>, vector<128x512xf32>
    %cst = arith.constant dense<0.000000e+00> : vector<8x512xf32>
    %12 = tpu.matmul %10, %11, %cst {dimension_numbers = #tpu.dot_dimension_numbers<[1], [0], [0], [1], [0, 0, 1, 1], [], []>} : vector<8x128xf32>, vector<128x512xf32>, vector<8x512xf32> -> vector<8x512xf32>
    %13 = arith.addf %9, %12 : vector<8x512xf32>
    %14 = vector.extract_strided_slice %13 {offsets = [0, 0], sizes = [8, 384], strides = [1, 1]} : vector<8x512xf32> to vector<8x384xf32>
    %15 = arith.negf %14 : vector<8x384xf32>
    %16 = math.exp %15 : vector<8x384xf32>
    %cst_9 = arith.constant 1.000000e+00 : f32
    %17 = vector.broadcast %cst_9 : f32 to vector<8x384xf32>
    %18 = arith.addf %17, %16 : vector<8x384xf32>
    %19 = arith.divf %17, %18 : vector<8x384xf32>
    %20 = vector.extract_strided_slice %19 {offsets = [0, 0], sizes = [8, 128], strides = [1, 1]} : vector<8x384xf32> to vector<8x128xf32>
    %21 = vector.extract_strided_slice %19 {offsets = [0, 128], sizes = [8, 128], strides = [1, 1]} : vector<8x384xf32> to vector<8x128xf32>
    %22 = vector.extract_strided_slice %19 {offsets = [0, 256], sizes = [8, 128], strides = [1, 1]} : vector<8x384xf32> to vector<8x128xf32>
    %23 = vector.extract_strided_slice %13 {offsets = [0, 384], sizes = [8, 128], strides = [1, 1]} : vector<8x512xf32> to vector<8x128xf32>
    %24 = math.tanh %23 : vector<8x128xf32>
    %c0_10 = arith.constant 0 : index
    %c0_11 = arith.constant 0 : index
    %25 = vector.load %arg7[%c0_10, %c0_11] : memref<8x128xf32, #tpu.memory_space<vmem>>, vector<8x128xf32>
    %26 = arith.mulf %21, %25 : vector<8x128xf32>
    %27 = arith.mulf %20, %24 : vector<8x128xf32>
    %28 = arith.addf %26, %27 : vector<8x128xf32>
    %29 = math.tanh %28 : vector<8x128xf32>
    %30 = arith.mulf %22, %29 : vector<8x128xf32>
    %31 = arith.addi %6, %c0_i32_2 : i32
    %32 = vector.broadcast %31 : i32 to vector<8x128xi32>
    %33 = arith.cmpi slt, %32, %5 : vector<8x128xi32>
    %c0_12 = arith.constant 0 : index
    %c0_13 = arith.constant 0 : index
    %34 = vector.load %arg7[%c0_12, %c0_13] : memref<8x128xf32, #tpu.memory_space<vmem>>, vector<8x128xf32>
    %35 = arith.select %33, %28, %34 : vector<8x128xi1>, vector<8x128xf32>
    %c0_14 = arith.constant 0 : index
    %c0_15 = arith.constant 0 : index
    %36 = vector.load %arg7[%c0_14, %c0_15] : memref<8x128xf32, #tpu.memory_space<vmem>>, vector<8x128xf32>
    tpu.vector_store %arg7[%c0_14, %c0_15], %35 {strides = array<i32>} : memref<8x128xf32, #tpu.memory_space<vmem>>, vector<8x128xf32>,
    %c0_16 = arith.constant 0 : index
    %c0_17 = arith.constant 0 : index
    %37 = vector.load %arg6[%c0_16, %c0_17] : memref<8x128xf32, #tpu.memory_space<vmem>>, vector<8x128xf32>
    %38 = arith.select %33, %30, %37 : vector<8x128xi1>, vector<8x128xf32>
    %c0_18 = arith.constant 0 : index
    %c0_19 = arith.constant 0 : index
    %39 = vector.load %arg6[%c0_18, %c0_19] : memref<8x128xf32, #tpu.memory_space<vmem>>, vector<8x128xf32>
    tpu.vector_store %arg6[%c0_18, %c0_19], %38 {strides = array<i32>} : memref<8x128xf32, #tpu.memory_space<vmem>>, vector<8x128xf32>,
    %c1_i32 = arith.constant 1 : i32
    %40 = arith.index_cast %c1_i32 : i32 to index
    %c0_20 = arith.constant 0 : index
    %c0_21 = arith.constant 0 : index
    %41 = vector.load %arg2[%40, %c0_20, %c0_21] : memref<4x8x512xf32, #tpu.memory_space<vmem>>, vector<1x8x512xf32>
    %42 = vector.shape_cast %41 : vector<1x8x512xf32> to vector<8x512xf32>
    %c0_22 = arith.constant 0 : index
    %c0_23 = arith.constant 0 : index
    %43 = vector.load %arg6[%c0_22, %c0_23] : memref<8x128xf32, #tpu.memory_space<vmem>>, vector<8x128xf32>
    %c0_24 = arith.constant 0 : index
    %c0_25 = arith.constant 0 : index
    %44 = vector.load %arg3[%c0_24, %c0_25] : memref<128x512xf32, #tpu.memory_space<vmem>>, vector<128x512xf32>
    %cst_26 = arith.constant dense<0.000000e+00> : vector<8x512xf32>
    %45 = tpu.matmul %43, %44, %cst_26 {dimension_numbers = #tpu.dot_dimension_numbers<[1], [0], [0], [1], [0, 0, 1, 1], [], []>} : vector<8x128xf32>, vector<128x512xf32>, vector<8x512xf32> -> vector<8x512xf32>
    %46 = arith.addf %42, %45 : vector<8x512xf32>
    %47 = vector.extract_strided_slice %46 {offsets = [0, 0], sizes = [8, 384], strides = [1, 1]} : vector<8x512xf32> to vector<8x384xf32>
    %48 = arith.negf %47 : vector<8x384xf32>
    %49 = math.exp %48 : vector<8x384xf32>
    %cst_27 = arith.constant 1.000000e+00 : f32
    %50 = vector.broadcast %cst_27 : f32 to vector<8x384xf32>
    %51 = arith.addf %50, %49 : vector<8x384xf32>
    %52 = arith.divf %50, %51 : vector<8x384xf32>
    %53 = vector.extract_strided_slice %52 {offsets = [0, 0], sizes = [8, 128], strides = [1, 1]} : vector<8x384xf32> to vector<8x128xf32>
    %54 = vector.extract_strided_slice %52 {offsets = [0, 128], sizes = [8, 128], strides = [1, 1]} : vector<8x384xf32> to vector<8x128xf32>
    %55 = vector.extract_strided_slice %52 {offsets = [0, 256], sizes = [8, 128], strides = [1, 1]} : vector<8x384xf32> to vector<8x128xf32>
    %56 = vector.extract_strided_slice %46 {offsets = [0, 384], sizes = [8, 128], strides = [1, 1]} : vector<8x512xf32> to vector<8x128xf32>
    %57 = math.tanh %56 : vector<8x128xf32>
    %c0_28 = arith.constant 0 : index
    %c0_29 = arith.constant 0 : index
    %58 = vector.load %arg7[%c0_28, %c0_29] : memref<8x128xf32, #tpu.memory_space<vmem>>, vector<8x128xf32>
    %59 = arith.mulf %54, %58 : vector<8x128xf32>
    %60 = arith.mulf %53, %57 : vector<8x128xf32>
    %61 = arith.addf %59, %60 : vector<8x128xf32>
    %62 = math.tanh %61 : vector<8x128xf32>
    %63 = arith.mulf %55, %62 : vector<8x128xf32>
    %64 = arith.addi %6, %c1_i32 : i32
    %65 = vector.broadcast %64 : i32 to vector<8x128xi32>
    %66 = arith.cmpi slt, %65, %5 : vector<8x128xi32>
    %c0_30 = arith.constant 0 : index
    %c0_31 = arith.constant 0 : index
    %67 = vector.load %arg7[%c0_30, %c0_31] : memref<8x128xf32, #tpu.memory_space<vmem>>, vector<8x128xf32>
    %68 = arith.select %66, %61, %67 : vector<8x128xi1>, vector<8x128xf32>
    %c0_32 = arith.constant 0 : index
    %c0_33 = arith.constant 0 : index
    %69 = vector.load %arg7[%c0_32, %c0_33] : memref<8x128xf32, #tpu.memory_space<vmem>>, vector<8x128xf32>
    tpu.vector_store %arg7[%c0_32, %c0_33], %68 {strides = array<i32>} : memref<8x128xf32, #tpu.memory_space<vmem>>, vector<8x128xf32>,
    %c0_34 = arith.constant 0 : index
    %c0_35 = arith.constant 0 : index
    %70 = vector.load %arg6[%c0_34, %c0_35] : memref<8x128xf32, #tpu.memory_space<vmem>>, vector<8x128xf32>
    %71 = arith.select %66, %63, %70 : vector<8x128xi1>, vector<8x128xf32>
    %c0_36 = arith.constant 0 : index
    %c0_37 = arith.constant 0 : index
    %72 = vector.load %arg6[%c0_36, %c0_37] : memref<8x128xf32, #tpu.memory_space<vmem>>, vector<8x128xf32>
    tpu.vector_store %arg6[%c0_36, %c0_37], %71 {strides = array<i32>} : memref<8x128xf32, #tpu.memory_space<vmem>>, vector<8x128xf32>,
    %c2_i32 = arith.constant 2 : i32
    %73 = arith.index_cast %c2_i32 : i32 to index
    %c0_38 = arith.constant 0 : index
    %c0_39 = arith.constant 0 : index
    %74 = vector.load %arg2[%73, %c0_38, %c0_39] : memref<4x8x512xf32, #tpu.memory_space<vmem>>, vector<1x8x512xf32>
    %75 = vector.shape_cast %74 : vector<1x8x512xf32> to vector<8x512xf32>
    %c0_40 = arith.constant 0 : index
    %c0_41 = arith.constant 0 : index
    %76 = vector.load %arg6[%c0_40, %c0_41] : memref<8x128xf32, #tpu.memory_space<vmem>>, vector<8x128xf32>
    %c0_42 = arith.constant 0 : index
    %c0_43 = arith.constant 0 : index
    %77 = vector.load %arg3[%c0_42, %c0_43] : memref<128x512xf32, #tpu.memory_space<vmem>>, vector<128x512xf32>
    %cst_44 = arith.constant dense<0.000000e+00> : vector<8x512xf32>
    %78 = tpu.matmul %76, %77, %cst_44 {dimension_numbers = #tpu.dot_dimension_numbers<[1], [0], [0], [1], [0, 0, 1, 1], [], []>} : vector<8x128xf32>, vector<128x512xf32>, vector<8x512xf32> -> vector<8x512xf32>
    %79 = arith.addf %75, %78 : vector<8x512xf32>
    %80 = vector.extract_strided_slice %79 {offsets = [0, 0], sizes = [8, 384], strides = [1, 1]} : vector<8x512xf32> to vector<8x384xf32>
    %81 = arith.negf %80 : vector<8x384xf32>
    %82 = math.exp %81 : vector<8x384xf32>
    %cst_45 = arith.constant 1.000000e+00 : f32
    %83 = vector.broadcast %cst_45 : f32 to vector<8x384xf32>
    %84 = arith.addf %83, %82 : vector<8x384xf32>
    %85 = arith.divf %83, %84 : vector<8x384xf32>
    %86 = vector.extract_strided_slice %85 {offsets = [0, 0], sizes = [8, 128], strides = [1, 1]} : vector<8x384xf32> to vector<8x128xf32>
    %87 = vector.extract_strided_slice %85 {offsets = [0, 128], sizes = [8, 128], strides = [1, 1]} : vector<8x384xf32> to vector<8x128xf32>
    %88 = vector.extract_strided_slice %85 {offsets = [0, 256], sizes = [8, 128], strides = [1, 1]} : vector<8x384xf32> to vector<8x128xf32>
    %89 = vector.extract_strided_slice %79 {offsets = [0, 384], sizes = [8, 128], strides = [1, 1]} : vector<8x512xf32> to vector<8x128xf32>
    %90 = math.tanh %89 : vector<8x128xf32>
    %c0_46 = arith.constant 0 : index
    %c0_47 = arith.constant 0 : index
    %91 = vector.load %arg7[%c0_46, %c0_47] : memref<8x128xf32, #tpu.memory_space<vmem>>, vector<8x128xf32>
    %92 = arith.mulf %87, %91 : vector<8x128xf32>
    %93 = arith.mulf %86, %90 : vector<8x128xf32>
    %94 = arith.addf %92, %93 : vector<8x128xf32>
    %95 = math.tanh %94 : vector<8x128xf32>
    %96 = arith.mulf %88, %95 : vector<8x128xf32>
    %97 = arith.addi %6, %c2_i32 : i32
    %98 = vector.broadcast %97 : i32 to vector<8x128xi32>
    %99 = arith.cmpi slt, %98, %5 : vector<8x128xi32>
    %c0_48 = arith.constant 0 : index
    %c0_49 = arith.constant 0 : index
    %100 = vector.load %arg7[%c0_48, %c0_49] : memref<8x128xf32, #tpu.memory_space<vmem>>, vector<8x128xf32>
    %101 = arith.select %99, %94, %100 : vector<8x128xi1>, vector<8x128xf32>
    %c0_50 = arith.constant 0 : index
    %c0_51 = arith.constant 0 : index
    %102 = vector.load %arg7[%c0_50, %c0_51] : memref<8x128xf32, #tpu.memory_space<vmem>>, vector<8x128xf32>
    tpu.vector_store %arg7[%c0_50, %c0_51], %101 {strides = array<i32>} : memref<8x128xf32, #tpu.memory_space<vmem>>, vector<8x128xf32>,
    %c0_52 = arith.constant 0 : index
    %c0_53 = arith.constant 0 : index
    %103 = vector.load %arg6[%c0_52, %c0_53] : memref<8x128xf32, #tpu.memory_space<vmem>>, vector<8x128xf32>
    %104 = arith.select %99, %96, %103 : vector<8x128xi1>, vector<8x128xf32>
    %c0_54 = arith.constant 0 : index
    %c0_55 = arith.constant 0 : index
    %105 = vector.load %arg6[%c0_54, %c0_55] : memref<8x128xf32, #tpu.memory_space<vmem>>, vector<8x128xf32>
    tpu.vector_store %arg6[%c0_54, %c0_55], %104 {strides = array<i32>} : memref<8x128xf32, #tpu.memory_space<vmem>>, vector<8x128xf32>,
    %c3_i32 = arith.constant 3 : i32
    %106 = arith.index_cast %c3_i32 : i32 to index
    %c0_56 = arith.constant 0 : index
    %c0_57 = arith.constant 0 : index
    %107 = vector.load %arg2[%106, %c0_56, %c0_57] : memref<4x8x512xf32, #tpu.memory_space<vmem>>, vector<1x8x512xf32>
    %108 = vector.shape_cast %107 : vector<1x8x512xf32> to vector<8x512xf32>
    %c0_58 = arith.constant 0 : index
    %c0_59 = arith.constant 0 : index
    %109 = vector.load %arg6[%c0_58, %c0_59] : memref<8x128xf32, #tpu.memory_space<vmem>>, vector<8x128xf32>
    %c0_60 = arith.constant 0 : index
    %c0_61 = arith.constant 0 : index
    %110 = vector.load %arg3[%c0_60, %c0_61] : memref<128x512xf32, #tpu.memory_space<vmem>>, vector<128x512xf32>
    %cst_62 = arith.constant dense<0.000000e+00> : vector<8x512xf32>
    %111 = tpu.matmul %109, %110, %cst_62 {dimension_numbers = #tpu.dot_dimension_numbers<[1], [0], [0], [1], [0, 0, 1, 1], [], []>} : vector<8x128xf32>, vector<128x512xf32>, vector<8x512xf32> -> vector<8x512xf32>
    %112 = arith.addf %108, %111 : vector<8x512xf32>
    %113 = vector.extract_strided_slice %112 {offsets = [0, 0], sizes = [8, 384], strides = [1, 1]} : vector<8x512xf32> to vector<8x384xf32>
    %114 = arith.negf %113 : vector<8x384xf32>
    %115 = math.exp %114 : vector<8x384xf32>
    %cst_63 = arith.constant 1.000000e+00 : f32
    %116 = vector.broadcast %cst_63 : f32 to vector<8x384xf32>
    %117 = arith.addf %116, %115 : vector<8x384xf32>
    %118 = arith.divf %116, %117 : vector<8x384xf32>
    %119 = vector.extract_strided_slice %118 {offsets = [0, 0], sizes = [8, 128], strides = [1, 1]} : vector<8x384xf32> to vector<8x128xf32>
    %120 = vector.extract_strided_slice %118 {offsets = [0, 128], sizes = [8, 128], strides = [1, 1]} : vector<8x384xf32> to vector<8x128xf32>
    %121 = vector.extract_strided_slice %118 {offsets = [0, 256], sizes = [8, 128], strides = [1, 1]} : vector<8x384xf32> to vector<8x128xf32>
    %122 = vector.extract_strided_slice %112 {offsets = [0, 384], sizes = [8, 128], strides = [1, 1]} : vector<8x512xf32> to vector<8x128xf32>
    %123 = math.tanh %122 : vector<8x128xf32>
    %c0_64 = arith.constant 0 : index
    %c0_65 = arith.constant 0 : index
    %124 = vector.load %arg7[%c0_64, %c0_65] : memref<8x128xf32, #tpu.memory_space<vmem>>, vector<8x128xf32>
    %125 = arith.mulf %120, %124 : vector<8x128xf32>
    %126 = arith.mulf %119, %123 : vector<8x128xf32>
    %127 = arith.addf %125, %126 : vector<8x128xf32>
    %128 = math.tanh %127 : vector<8x128xf32>
    %129 = arith.mulf %121, %128 : vector<8x128xf32>
    %130 = arith.addi %6, %c3_i32 : i32
    %131 = vector.broadcast %130 : i32 to vector<8x128xi32>
    %132 = arith.cmpi slt, %131, %5 : vector<8x128xi32>
    %c0_66 = arith.constant 0 : index
    %c0_67 = arith.constant 0 : index
    %133 = vector.load %arg7[%c0_66, %c0_67] : memref<8x128xf32, #tpu.memory_space<vmem>>, vector<8x128xf32>
    %134 = arith.select %132, %127, %133 : vector<8x128xi1>, vector<8x128xf32>
    %c0_68 = arith.constant 0 : index
    %c0_69 = arith.constant 0 : index
    %135 = vector.load %arg7[%c0_68, %c0_69] : memref<8x128xf32, #tpu.memory_space<vmem>>, vector<8x128xf32>
    tpu.vector_store %arg7[%c0_68, %c0_69], %134 {strides = array<i32>} : memref<8x128xf32, #tpu.memory_space<vmem>>, vector<8x128xf32>,
    %c0_70 = arith.constant 0 : index
    %c0_71 = arith.constant 0 : index
    %136 = vector.load %arg6[%c0_70, %c0_71] : memref<8x128xf32, #tpu.memory_space<vmem>>, vector<8x128xf32>
    %137 = arith.select %132, %129, %136 : vector<8x128xi1>, vector<8x128xf32>
    %c0_72 = arith.constant 0 : index
    %c0_73 = arith.constant 0 : index
    %138 = vector.load %arg6[%c0_72, %c0_73] : memref<8x128xf32, #tpu.memory_space<vmem>>, vector<8x128xf32>
    tpu.vector_store %arg6[%c0_72, %c0_73], %137 {strides = array<i32>} : memref<8x128xf32, #tpu.memory_space<vmem>>, vector<8x128xf32>,
    %c4_i32_74 = arith.constant 4 : i32
    %c1_i32_75 = arith.constant 1 : i32
    %139 = arith.cmpi eq, %arg1, %c1_i32_75 : i32
    %140 = arith.extui %139 : i1 to i32
    %c0_i32_76 = arith.constant 0 : i32
    %141 = arith.cmpi ne, %140, %c0_i32_76 : i32
    scf.if %141 {
      %c0_77 = arith.constant 0 : index
      %c0_78 = arith.constant 0 : index
      %142 = vector.load %arg6[%c0_77, %c0_78] : memref<8x128xf32, #tpu.memory_space<vmem>>, vector<8x128xf32>
      %c0_79 = arith.constant 0 : index
      %c0_80 = arith.constant 0 : index
      %143 = vector.load %arg5[%c0_79, %c0_80] : memref<8x128xf32, #tpu.memory_space<vmem>>, vector<8x128xf32>
      tpu.vector_store %arg5[%c0_79, %c0_80], %142 {strides = array<i32>} : memref<8x128xf32, #tpu.memory_space<vmem>>, vector<8x128xf32>,
    } else {
    }
    return
  }
  func.func @transform_0(%arg0: i32, %arg1: i32) -> (i32, i32, i32) {
    %c0_i32 = arith.constant 0 : i32
    %c0_i32_0 = arith.constant 0 : i32
    return %arg1, %arg0, %c0_i32 : i32, i32, i32
  }
  func.func @transform_1(%arg0: i32, %arg1: i32) -> (i32, i32) {
    %c0_i32 = arith.constant 0 : i32
    %c0_i32_0 = arith.constant 0 : i32
    %c0_i32_1 = arith.constant 0 : i32
    return %c0_i32, %c0_i32_0 : i32, i32
  }
  func.func @transform_2(%arg0: i32, %arg1: i32) -> (i32, i32) {
    %c0_i32 = arith.constant 0 : i32
    %c0_i32_0 = arith.constant 0 : i32
    return %arg0, %c0_i32 : i32, i32
  }
  func.func @transform_3(%arg0: i32, %arg1: i32) -> (i32, i32) {
    %c0_i32 = arith.constant 0 : i32
    %c0_i32_0 = arith.constant 0 : i32
    return %arg0, %c0_i32 : i32, i32
  }
}

</mosaic_0001>

<bundles_post_ra>
// kernel: attentive_rnn_forward.1
= control target key start
LH: loop header
LB: loop body
LE: loop exit
PB: predicated region body
PF: predicated region fallthrough
CT: control target
= control target key end

     0   :  { %8 = vsyncpa [#allocation5], 0  ;;  %s2483_s0 = inlined_call_operand.hbm [shape: f32[8,8,512], index: 0, kind: input, shape index: {}]   ;;  %s2484_s1 = inlined_call_operand.hbm [shape: f32[128,512], index: 1, kind: input, shape index: {}]   ;;  %s2485_s2 = inlined_call_operand.hbm [shape: s32[8,1], index: 2, kind: input, shape index: {}]   ;;  %s2486_s3 = inlined_call_operand.hbm [shape: f32[8,128], index: 3, kind: output, shape index: {}]  }
   0x1   :  { %10 = vsyncpa [#allocation5 + $0x1], 0 }
   0x2   :  { %11 = vsyncpa [#allocation8], 0 }
   0x3   :  { %12 = vsyncpa [#allocation6], 0  ;;  %s1995_s12 = smov 0   ;;  %s1997_s13 = smov 0  }
   0x4   :  { %s1999_s14 = smov 0   ;;  %s2001_s15 = smov 0  }
   0x5   :  { %s2003_s16 = smov 0   ;;  %s2005_s17 = smov 0  }
   0x6 LB: > { %s1339_s18 = sadd.s32 4294967295, %s1964_s17   ;;  %p52_p0 = scmp.ne.s32.totalorder %s1948_s13, %s1944_s12  ;;  %s1964_s17 = sphi %s2005_s17, %s18_s17   ;;  %s1960_s16 = sphi %s2003_s16, %s2504_s16   ;;  %s1956_s15 = sphi %s2001_s15, %s2503_s15   ;;  %s1952_s14 = sphi %s1999_s14, %s2502_s14   ;;  %s1948_s13 = sphi %s1997_s13, %s2501_s13   ;;  %s1944_s12 = sphi %s1995_s12, %s2500_s12  }
   0x7   : > { %p2027_p1 = scmp.eq.s32.totalorder %s1339_s18, 0  ;;  %p1340_p2 = scmp.ge.s32.totalorder %s1964_s17, 1 }
   0x8   : > { %p136_p3 = scmp.lt.s32.totalorder %s1964_s17, 3  ;;  %s1966_s22 = smov [#allocation7]  }
   0x9   : > { %s2491_s19 = scalar_select %p2027_p1, 1, 0 }
   0xa   : > { %p2035_p4 = por %p2027_p1, %p52_p0  ;;  %p2039_p5 = pnand %p1340_p2, %p136_p3 }
   0xb   : > { %s148_s23 = sshll.u32 %s1966_s22, 4  ;;  %s1967_s25 = smov [#allocation9]   ;;  %s149_s23 = int_to_ptr.vmem [resolvable:$true] %s148_s23 }
   0xc   : > { %s2492_s20 = scalar_select %p2035_p4, 1, 0 }
   0xd   : > { %s2493_s21 = scalar_select %p2039_p5, 1, 0 }
   0xe   : > { %p1655_p6 = pneg %p2039_p5  ;;  %s164_s26 = sshll.u32 %s1967_s25, 4  ;;  %s2051_s26 = int_to_ptr.vmem [resolvable:$true] %s164_s26 }
   0xf   : > { %s1794_s29 = scalar_lea.hbm %s2484_s1, 8192 }
  0x10   : > { %p2047_p7 = pnand %p1655_p6, %p2027_p1  ;;  %p1795_p8 = scmp.ne.s32.totalorder %s2484_s1, %s1794_s29 }
  0x11   : > { %p1801_p12 = scmp.lt.u32.totalorder %s1794_s29, %s2484_s1 }
  0x12   : > { %p1796_p9 = pneg %p2047_p7 }
  0x14   : > { %p1797_p10 = pnand %p1796_p9, %p1795_p8 }
  0x16   : > { %p1798_p11 = pneg %p1797_p10 }
  0x18   : > { %p1803_p13 = pnand %p1801_p12, %p1798_p11 }
  0x1a   : > { %1806 = shalt.err (!%p1803_p13)
}
  0x1b   : > { %s1807_s7 = scalar_lea.vmem %s149_s23, 8192  ;;  %p1815_p6 = scmp.lt.s32.totalorder %s149_s23, %s149_s23 }
  0x1c   : > { %p1808_p0 = scmp.ne.s32.totalorder %s149_s23, %s1807_s7  ;;  %p1816_p1 = scmp.lt.s32.totalorder %s1807_s7, %s1807_s7 }
  0x1e   : > { %p1810_p2 = pnand %p1808_p0, %p1796_p9  ;;  %p1817_p4 = por %p1816_p1, %p1815_p6 }
  0x20   : > { %p1811_p3 = pneg %p1810_p2 }
  0x22   : > { %p1818_p5 = pnand %p1817_p4, %p1811_p3 }
  0x24   : > { %1821 = shalt.err (!%p1818_p5)
}
  0x25   : > { %s1968_s8 = smov 512   ;;  %s1969_s9 = smov 32  }
  0x26   : > { %1658 = dma.hbm_to_vmem [thread:$0]  (!%p2047_p7), %s2484_s1, 8192, %s149_s23, [#allocation8], %s1968_s8, %s1968_s8, %s1969_s9  }
  0x27   : > { %s1822_s25 = scalar_lea.hbm %s2485_s2, 128 }
  0x28   : > { %p1823_p1 = scmp.ne.s32.totalorder %s2485_s2, %s1822_s25  ;;  %p1829_p8 = scmp.lt.u32.totalorder %s1822_s25, %s2485_s2 }
  0x2a   : > { %p1825_p4 = pnand %p1823_p1, %p1796_p9 }
  0x2c   : > { %p1826_p5 = pneg %p1825_p4 }
  0x2e   : > { %p1831_p10 = pnand %p1829_p8, %p1826_p5 }
  0x30   : > { %1834 = shalt.err (!%p1831_p10)
}
  0x31   : > { %s1835_s23 = scalar_lea.vmem %s2051_s26, 128  ;;  %p1843_p0 = scmp.lt.s32.totalorder %s2051_s26, %s2051_s26 }
  0x32   : > { %p1836_p11 = scmp.ne.s32.totalorder %s2051_s26, %s1835_s23  ;;  %p1844_p2 = scmp.lt.s32.totalorder %s1835_s23, %s1835_s23 }
  0x34   : > { %p1838_p12 = pnand %p1836_p11, %p1796_p9  ;;  %p1845_p3 = por %p1844_p2, %p1843_p0 }
  0x36   : > { %p1839_p13 = pneg %p1838_p12 }
  0x38   : > { %p1846_p6 = pnand %p1845_p3, %p1839_p13 }
  0x3a   : > { %1849 = shalt.err (!%p1846_p6)
}
  0x3b   : > { %1661 = dma.hbm_to_vmem [thread:$0]  (!%p2047_p7), %s2485_s2, 128, %s2051_s26, [#allocation8]  }
  0x3c   : > { %s27_s6 = sadd.s32 1, %s1960_s16  ;;  %s39_s7 = sadd.s32 1, %s1952_s14 }
  0x3d   : > { %p28_p9 = scmp.ge.s32.totalorder %s27_s6, 2  ;;  %p46_p1 = scmp.ne.s32.totalorder %s1952_s14, %s1948_s13 }
  0x3e   : > { %p47_p4 = scmp.eq.s32.totalorder %s1964_s17, 0  ;;  %p1668_p5 = scmp.lt.s32.totalorder %s1964_s17, 2 }
  0x3f   : > { %s2506_s6 = smov (%p28_p9, %s27_s6), 0  ;;  %s175_s24 = sand.u32 1, %s1952_s14  }
  0x40   : > { %p48_p8 = por %p47_p4, %p46_p1  ;;  %s34_s10 = ssub.s32 %s1960_s16, %s2506_s6 }
  0x41   : > { %p37_p10 = scmp.eq.s32.totalorder %s34_s10, 0  ;;  %s1344_s11 = sshll.u32 %s175_s24, 7 }
  0x42   : > { %s1384_s12 = sshll.u32 %s1960_s16, 11  ;;  %s179_s28 = scalar_lea.vmem [#allocation4], %s1344_s11 }
  0x43   : > { %s2116_s22 = scalar_select %p37_p10, %s1952_s14, %s39_s7  }
  0x44   : > { %s2121_s27 = scalar_lea.hbm %s2483_s0, %s1384_s12  ;;  %s189_s29 = sshll.u32 %s179_s28, 4  ;;  %s2123_s29 = int_to_ptr.vmem [resolvable:$true] %s189_s29 }
  0x45   : > { %p2127_p7 = pnand %p1668_p5, %p48_p8  ;;  %s2131_s23 = scalar_lea.sflag [#allocation5], %s175_s24 }
  0x46   : > { %s1850_s4 = scalar_lea.hbm %s2121_s27, 2048  ;;  %s1855_s10 = scalar_lea.hbm %s2483_s0, 4096 }
  0x47   : > { %p1851_p11 = scmp.ne.s32.totalorder %s2121_s27, %s1850_s4  ;;  %p1852_p12 = pneg %p2127_p7 }
  0x48   : > { %p1856_p2 = scmp.lt.u32.totalorder %s2121_s27, %s2483_s0  ;;  %p1857_p3 = scmp.lt.u32.totalorder %s1855_s10, %s1850_s4 }
  0x49   : > { %p1853_p13 = pnand %p1852_p12, %p1851_p11  ;;  %p1859_p9 = scmp.lt.u32.totalorder %s1850_s4, %s2121_s27 }
  0x4a   : > { %p1858_p6 = por %p1857_p3, %p1856_p2 }
  0x4b   : > { %p1854_p0 = pneg %p1853_p13 }
  0x4c   : > { %p1860_p1 = por %p1859_p9, %p1858_p6 }
  0x4e   : > { %p1861_p4 = pnand %p1860_p1, %p1854_p0 }
  0x50   : > { %1864 = shalt.err (!%p1861_p4)
}
  0x51   : > { %s1865_s24 = scalar_lea.vmem %s2123_s29, 2048  ;;  %s1970_s25 = smov [#allocation4]  }
  0x52   : > { %p1866_p5 = scmp.ne.s32.totalorder %s2123_s29, %s1865_s24  ;;  %s1870_s26 = sshll.u32 %s1970_s25, 4  ;;  %s1871_s26 = int_to_ptr.vmem [resolvable:$false] %s1870_s26 }
  0x53   : > { %s1872_s28 = scalar_lea.vmem %s1871_s26, 4096  ;;  %p1873_p11 = scmp.lt.s32.totalorder %s2123_s29, %s1871_s26 }
  0x54   : > { %p1868_p8 = pnand %p1866_p5, %p1852_p12  ;;  %p1874_p13 = scmp.lt.s32.totalorder %s1872_s28, %s1865_s24 }
  0x56   : > { %p1869_p10 = pneg %p1868_p8  ;;  %p1875_p2 = por %p1874_p13, %p1873_p11 }
  0x58   : > { %p1876_p3 = pnand %p1875_p2, %p1869_p10 }
  0x5a   : > { %1879 = shalt.err (!%p1876_p3)
}
  0x5b   : > { %1665 = dma.hbm_to_vmem [thread:$0]  (!%p2127_p7), %s2121_s27, 2048, %s2123_s29, %s2131_s23, %s1968_s8, %s1968_s8, %s1969_s9  }
  0x5c   : > { %p2496_p12 = scmp.ne.s32.totalorder %s2493_s21, 0 }
  0x5d   : > { %s203_s4 = sand.u32 (!%p2496_p12), 1, %s1948_s13   ;;  %p2497_p0 = scmp.ne.s32.totalorder (!%p2496_p12), %s2492_s20, 0 }
  0x5e   : > { %201 = sbr.rel (%p2496_p12) target bundleno = 1220 (0x4c4), region = 32  ;;  %s1349_s5 = sshll.u32 (!%p2496_p12), %s203_s4, 7 }
  0x5f   : > { %s204_s7 = scalar_lea.sflag (!%p2496_p12), [#allocation5], %s203_s4  ;;  %s2165_s10 = scalar_lea.vmem (!%p2496_p12), [#allocation4], %s1349_s5 }
  0x65   : > { %1931 = dma.done.wait (%p2497_p0), %s204_s7, 2048  }
  0x66   : > { %1933 = vsyncadd (%p2497_p0), %s204_s7, 4294965248  ;;  %p2498_p6 = scmp.ne.s32.totalorder %s2491_s19, 0 }
  0x68   : > { %1935 = dma.done.wait (%p2498_p6), [#allocation8], 8320  }
  0x69   : > { %1937 = vsyncadd (%p2498_p6), [#allocation8], 4294958976  ;;  %p1352_p7 = scmp.ne.s32.totalorder %s1956_s15, 0 }
  0x6a   : > { %v1971_v0 = vmov (!%p1352_p7), 0.0  }
  0x6b   : > { %237 = sbr.rel (%p1352_p7) target bundleno = 114 (0x72), region = 48  ;;  %238 = vst [vmem:[#allocation2] sm:$0xff] (!%p1352_p7), %v1971_v0  ;;  %239 = vst [vmem:[#allocation3] sm:$0xff] (!%p1352_p7), %v1971_v0 }
  0x72 PF: > { %v251_v1 = vld [vmem:[#allocation7 + $0x8] sm:$0xff]  ;;  %v250_v3 = vld [vmem:[#allocation7] sm:$0xff]  ;;  %v1972_v8 = vmov 0.0   ;;  %v1973_v14 = vmov 0   ;;  %v253_v21 = vld [vmem:[#allocation7 + $0x18] sm:$0xff]  ;;  %s2315_s19 = sshll.u32 %s1956_s15, 2 }
  0x73   : > { %v255_v2 = vld [vmem:[#allocation7 + $0x28] sm:$0xff]  ;;  %v254_v5 = vld [vmem:[#allocation7 + $0x20] sm:$0xff]  ;;  %378 = vmatprep.mubr.f32.mxu0 %v1972_v8  ;;  %449 = vmatprep.mubr.f32.mxu1 %v1972_v8  ;;  %v257_v22 = vld [vmem:[#allocation7 + $0x38] sm:$0xff]  ;;  %s733_s20 = sadd.s32 1, %s2315_s19  ;;  %s982_s21 = sadd.s32 2, %s2315_s19 }
  0x74   : > { %v2176_v4 = vpack.c.bf16 %v255_v2, %v251_v1  ;;  %v259_v6 = vld [vmem:[#allocation7 + $0x48] sm:$0xff]  ;;  %v2180_v9 = vpack.c.bf16 %v254_v5, %v250_v3  ;;  %v258_v11 = vld [vmem:[#allocation7 + $0x40] sm:$0xff]  ;;  %1729 = vset.pattern.permute.xlu0 %v1973_v14  ;;  %v2191_v24 = vpack.c.bf16 %v257_v22, %v253_v21  ;;  %v252_v25 = vld [vmem:[#allocation7 + $0x10] sm:$0xff]  ;;  %s1231_s8 = sadd.s32 3, %s2315_s19  ;;  %p1378_p9 = scmp.ne.s32.totalorder %s1956_s15, 1 }
  0x75   : > { %v263_v7 = vld [vmem:[#allocation7 + $0x68] sm:$0xff]  ;;  %v262_v12 = vld [vmem:[#allocation7 + $0x60] sm:$0xff]  ;;  %v256_v26 = vld [vmem:[#allocation7 + $0x30] sm:$0xff] }
  0x76   : > { %v2182_v10 = vpack.c.bf16 %v263_v7, %v259_v6  ;;  %v267_v13 = vld [vmem:[#allocation7 + $0x88] sm:$0xff]  ;;  %1386 = vmatprep.subr.bf16.mxu0 %v2176_v4  ;;  %v2186_v16 = vpack.c.bf16 %v262_v12, %v258_v11  ;;  %v266_v17 = vld [vmem:[#allocation7 + $0x80] sm:$0xff]  ;;  %v2193_v27 = vpack.c.bf16 %v256_v26, %v252_v25  ;;  %1418 = vmatprep.subr.bf16.mxu1 %v2191_v24  ;;  %v261_v29 = vld [vmem:[#allocation7 + $0x58] sm:$0xff] }
  0x77   : > { %v271_v15 = vld [vmem:[#allocation7 + $0xa8] sm:$0xff]  ;;  %1388 = vmatpush1.bf16.msra.mxu0 %v2180_v9  ;;  %v270_v18 = vld [vmem:[#allocation7 + $0xa0] sm:$0xff]  ;;  %v265_v30 = vld [vmem:[#allocation7 + $0x78] sm:$0xff] }
  0x78   : > { %1390 = vmatprep.subr.bf16.mxu0 %v2182_v10  ;;  %v2189_v19 = vpack.c.bf16 %v271_v15, %v267_v13  ;;  %v275_v20 = vld [vmem:[#allocation7 + $0xc8] sm:$0xff]  ;;  %v2196_v28 = vpack.c.bf16 %v270_v18, %v266_v17  ;;  %v260_v31 = vld [vmem:[#allocation7 + $0x50] sm:$0xff]  ;;  %v274_v33 = vld [vmem:[#allocation7 + $0xc0] sm:$0xff]  ;;  %1420 = vmatpush1.bf16.msra.mxu1 %v2193_v27  ;;  %v2203_v35 = vpack.c.bf16 %v265_v30, %v261_v29 }
  0x79   : > { %v279_v23 = vld [vmem:[#allocation7 + $0xe8] sm:$0xff]  ;;  %v278_v34 = vld [vmem:[#allocation7 + $0xe0] sm:$0xff]  ;;  %v264_v36 = vld [vmem:[#allocation7 + $0x70] sm:$0xff] }
  0x7a   : > { %v2200_v32 = vpack.c.bf16 %v279_v23, %v275_v20  ;;  %v283_v37 = vld [vmem:[#allocation7 + $0x108] sm:$0xff]  ;;  %v2205_v39 = vpack.c.bf16 %v264_v36, %v260_v31  ;;  %v269_v40 = vld [vmem:[#allocation7 + $0x98] sm:$0xff]  ;;  %1422 = vmatprep.subr.bf16.mxu1 %v2203_v35  ;;  %v268_v42 = vld [vmem:[#allocation7 + $0x90] sm:$0xff]  ;;  %v2209_v44 = vpack.c.bf16 %v278_v34, %v274_v33 }
  0x7b   : > { %1392 = vmatpush1.bf16.msra.mxu0 %v2186_v16  ;;  %v287_v38 = vld [vmem:[#allocation7 + $0x128] sm:$0xff]  ;;  %v273_v41 = vld [vmem:[#allocation7 + $0xb8] sm:$0xff]  ;;  %v272_v43 = vld [vmem:[#allocation7 + $0xb0] sm:$0xff] }
  0x7c   : > { %1394 = vmatprep.subr.bf16.mxu0 %v2189_v19  ;;  %v282_v45 = vld [vmem:[#allocation7 + $0x100] sm:$0xff]  ;;  %v2211_v47 = vpack.c.bf16 %v273_v41, %v269_v40  ;;  %v2214_v48 = vpack.c.bf16 %v287_v38, %v283_v37  ;;  %1424 = vmatpush1.bf16.msra.mxu1 %v2205_v39  ;;  %v291_v49 = vld [vmem:[#allocation7 + $0x148] sm:$0xff]  ;;  %v2217_v50 = vpack.c.bf16 %v272_v43, %v268_v42  ;;  %v277_v51 = vld [vmem:[#allocation7 + $0xd8] sm:$0xff] }
  0x7d   : > { %v286_v46 = vld [vmem:[#allocation7 + $0x120] sm:$0xff]  ;;  %v281_v52 = vld [vmem:[#allocation7 + $0xf8] sm:$0xff]  ;;  %v295_v53 = vld [vmem:[#allocation7 + $0x168] sm:$0xff] }
  0x7e   : > { %1426 = vmatprep.subr.bf16.mxu1 %v2211_v47  ;;  %v2220_v54 = vpack.c.bf16 %v281_v52, %v277_v51  ;;  %v276_v55 = vld [vmem:[#allocation7 + $0xd0] sm:$0xff]  ;;  %v2223_v57 = vpack.c.bf16 %v286_v46, %v282_v45  ;;  %v285_v58 = vld [vmem:[#allocation7 + $0x118] sm:$0xff]  ;;  %v2226_v60 = vpack.c.bf16 %v295_v53, %v291_v49  ;;  %v290_v61 = vld [vmem:[#allocation7 + $0x140] sm:$0xff]  ;;  %v2319_v53 = vstv %s733_s20 }
  0x7f   : > { %1396 = vmatpush1.bf16.msra.mxu0 %v2196_v28  ;;  %v280_v56 = vld [vmem:[#allocation7 + $0xf0] sm:$0xff]  ;;  %v289_v59 = vld [vmem:[#allocation7 + $0x138] sm:$0xff]  ;;  %v294_v62 = vld [vmem:[#allocation7 + $0x160] sm:$0xff] }
  0x80   : > { %1398 = vmatprep.subr.bf16.mxu0 %v2200_v32  ;;  %1428 = vmatpush1.bf16.msra.mxu1 %v2217_v50  ;;  %v299_v63 = vld [vmem:[#allocation7 + $0x188] sm:$0xff]  ;;  %v2229_v0 = vpack.c.bf16 %v280_v56, %v276_v55  ;;  %v2232_v2 = vpack.c.bf16 %v289_v59, %v285_v58  ;;  %v284_v3 = vld [vmem:[#allocation7 + $0x110] sm:$0xff]  ;;  %v293_v6 = vld [vmem:[#allocation7 + $0x158] sm:$0xff]  ;;  %v2235_v11 = vpack.c.bf16 %v294_v62, %v290_v61  ;;  %v2321_v55 = vstv %s982_s21 }
  0x81   : > { %v303_v1 = vld [vmem:[#allocation7 + $0x1a8] sm:$0xff]  ;;  %1430 = vmatprep.subr.bf16.mxu1 %v2220_v54  ;;  %v288_v5 = vld [vmem:[#allocation7 + $0x130] sm:$0xff]  ;;  %v297_v7 = vld [vmem:[#allocation7 + $0x178] sm:$0xff]  ;;  %v2326_v56 = vstv %s1231_s8 }
  0x82   : > { %v298_v12 = vld [vmem:[#allocation7 + $0x180] sm:$0xff]  ;;  %v2238_v13 = vpack.c.bf16 %v303_v1, %v299_v63  ;;  %v307_v15 = vld [vmem:[#allocation7 + $0x1c8] sm:$0xff]  ;;  %v2241_v17 = vpack.c.bf16 %v288_v5, %v284_v3  ;;  %v2244_v21 = vpack.c.bf16 %v297_v7, %v293_v6  ;;  %v292_v22 = vld [vmem:[#allocation7 + $0x150] sm:$0xff] }
  0x83   : > { %1400 = vmatpush1.bf16.msra.mxu0 %v2209_v44  ;;  %v302_v14 = vld [vmem:[#allocation7 + $0x1a0] sm:$0xff]  ;;  %v311_v20 = vld [vmem:[#allocation7 + $0x1e8] sm:$0xff]  ;;  %v296_v23 = vld [vmem:[#allocation7 + $0x170] sm:$0xff] }
  0x84   : > { %1402 = vmatprep.subr.bf16.mxu0 %v2214_v48  ;;  %1432 = vmatpush1.bf16.msra.mxu1 %v2229_v0  ;;  %v240_v18 = vld [vmem:[#allocation9] sm:$0xff]  ;;  %v301_v25 = vld [vmem:[#allocation7 + $0x198] sm:$0xff]  ;;  %v2247_v29 = vpack.c.bf16 %v302_v14, %v298_v12  ;;  %v2250_v30 = vpack.c.bf16 %v311_v20, %v307_v15  ;;  %v2253_v34 = vpack.c.bf16 %v296_v23, %v292_v22  ;;  %v300_v37 = vld [vmem:[#allocation7 + $0x190] sm:$0xff] }
  0x85   : > { %1434 = vmatprep.subr.bf16.mxu1 %v2232_v2  ;;  %242 = vperm.xlu0 %1729, %v240_v18   ;;  %v305_v26 = vld [vmem:[#allocation7 + $0x1b8] sm:$0xff]  ;;  %v306_v31 = vld [vmem:[#allocation7 + $0x1c0] sm:$0xff]  ;;  %v304_v38 = vld [vmem:[#allocation7 + $0x1b0] sm:$0xff] }
  0x86   : > { %v310_v33 = vld [vmem:[#allocation7 + $0x1e0] sm:$0xff]  ;;  %v2256_v36 = vpack.c.bf16 %v305_v26, %v301_v25  ;;  %v309_v40 = vld [vmem:[#allocation7 + $0x1d8] sm:$0xff]  ;;  %v2263_v43 = vpack.c.bf16 %v304_v38, %v300_v37  ;;  %v308_v46 = vld [vmem:[#allocation7 + $0x1d0] sm:$0xff] }
  0x87   : > { %1404 = vmatpush1.bf16.msra.mxu0 %v2223_v57  ;;  %v313_v41 = vld [vmem:[#allocation7 + $0x1f8] sm:$0xff]  ;;  %v2259_v42 = vpack.c.bf16 %v310_v33, %v306_v31  ;;  %v312_v49 = vld [vmem:[#allocation7 + $0x1f0] sm:$0xff]  ;;  %v245_v58 = vld [vmem:[%s2165_s10] sm:$0xff] }
  0x88   : > { %1406 = vmatprep.subr.bf16.mxu0 %v2226_v60  ;;  %1436 = vmatpush1.bf16.msra.mxu1 %v2241_v17  ;;  %v2266_v45 = vpack.c.bf16 %v313_v41, %v309_v40  ;;  %v2269_v51 = vld [vmem:[#allocation2] sm:$0xff]  ;;  %v2272_v52 = vpack.c.bf16 %v312_v49, %v308_v46  ;;  %v246_v59 = vld [vmem:[%s2165_s10 + $0x8] sm:$0xff]  ;;  %v248_v15 = vld [vmem:[%s2165_s10 + $0x18] sm:$0xff]  ;;  %v485_v41 = vstv %s2315_s19 }
  0x89   : > { %1438 = vmatprep.subr.bf16.mxu1 %v2244_v21  ;;  %v247_v6 = vld [vmem:[%s2165_s10 + $0x10] sm:$0xff]  ;;  %v479_v37 = vld [vmem:[#allocation3] sm:$0xff] }
  0x8b   : > { %1408 = vmatpush1.bf16.msra.mxu0 %v2235_v11 }
  0x8c   : > { %1410 = vmatprep.subr.bf16.mxu0 %v2238_v13  ;;  %1440 = vmatpush1.bf16.msra.mxu1 %v2253_v34 }
  0x8d   : > { %1442 = vmatprep.subr.bf16.mxu1 %v2256_v36 }
  0x8f   : > { %1412 = vmatpush1.bf16.msra.mxu0 %v2247_v29 }
  0x90   : > { %1414 = vmatprep.subr.bf16.mxu0 %v2250_v30  ;;  %1444 = vmatpush1.bf16.msra.mxu1 %v2263_v43 }
  0x91   : > { %1446 = vmatprep.subr.bf16.mxu1 %v2266_v45 }
  0x93   : > { %1416 = vmatpush1.bf16.msra.mxu0 %v2259_v42 }
  0x94   : > { %1450 = vmatprep.subr.bf16.mxu0 %v2176_v4  ;;  %1448 = vmatpush1.bf16.msra.mxu1 %v2272_v52 }
  0x95   : > { %1482 = vmatprep.subr.bf16.mxu1 %v2191_v24 }
  0x96   : > { %379 = vmatmul.mubr.f32.vlgmr.msra.gmra.mrb[0].mxu0 %v2269_v51 }
  0x97   : > { %1452 = vmatpush1.bf16.msra.mxu0 %v2180_v9  ;;  %626 = vmatprep.mubr.f32.mxu0 %v1972_v8 }
  0x98   : > { %1454 = vmatprep.subr.bf16.mxu0 %v2182_v10  ;;  %450 = vmatmul.mubr.f32.vlgmr.msra.gmra.mrb[0].mxu1 %v2269_v51 }
  0x99   : > { %1484 = vmatpush1.bf16.msra.mxu1 %v2193_v27  ;;  %697 = vmatprep.mubr.f32.mxu1 %v1972_v8 }
  0x9a   : > { %1486 = vmatprep.subr.bf16.mxu1 %v2203_v35 }
  0x9b   : > { %1456 = vmatpush1.bf16.msra.mxu0 %v2186_v16 }
  0x9c   : > { %1458 = vmatprep.subr.bf16.mxu0 %v2189_v19 }
  0x9d   : > { %1488 = vmatpush1.bf16.msra.mxu1 %v2205_v39 }
  0x9e   : > { %1490 = vmatprep.subr.bf16.mxu1 %v2211_v47 }
  0x9f   : > { %1460 = vmatpush1.bf16.msra.mxu0 %v2196_v28 }
  0xa0   : > { %1462 = vmatprep.subr.bf16.mxu0 %v2200_v32 }
  0xa1   : > { %1492 = vmatpush1.bf16.msra.mxu1 %v2217_v50 }
  0xa2   : > { %1494 = vmatprep.subr.bf16.mxu1 %v2220_v54 }
  0xa3   : > { %1464 = vmatpush1.bf16.msra.mxu0 %v2209_v44 }
  0xa4   : > { %1466 = vmatprep.subr.bf16.mxu0 %v2214_v48 }
  0xa5   : > { %1496 = vmatpush1.bf16.msra.mxu1 %v2229_v0 }
  0xa6   : > { %1498 = vmatprep.subr.bf16.mxu1 %v2232_v2 }
  0xa7   : > { %1468 = vmatpush1.bf16.msra.mxu0 %v2223_v57 }
  0xa8   : > { %1470 = vmatprep.subr.bf16.mxu0 %v2226_v60 }
  0xa9   : > { %1500 = vmatpush1.bf16.msra.mxu1 %v2241_v17 }
  0xaa   : > { %1502 = vmatprep.subr.bf16.mxu1 %v2244_v21 }
  0xab   : > { %1472 = vmatpush1.bf16.msra.mxu0 %v2235_v11 }
  0xac   : > { %1474 = vmatprep.subr.bf16.mxu0 %v2238_v13 }
  0xad   : > { %1504 = vmatpush1.bf16.msra.mxu1 %v2253_v34 }
  0xae   : > { %1506 = vmatprep.subr.bf16.mxu1 %v2256_v36 }
  0xaf   : > { %1476 = vmatpush1.bf16.msra.mxu0 %v2247_v29 }
  0xb0   : > { %1478 = vmatprep.subr.bf16.mxu0 %v2250_v30 }
  0xb1   : > { %1508 = vmatpush1.bf16.msra.mxu1 %v2263_v43 }
  0xb2   : > { %1510 = vmatprep.subr.bf16.mxu1 %v2266_v45 }
  0xb3   : > { %1480 = vmatpush1.bf16.msra.mxu0 %v2259_v42 }
  0xb4   : > { %1514 = vmatprep.subr.bf16.mxu0 %v2176_v4 }
  0xb5   : > { %1512 = vmatpush1.bf16.msra.mxu1 %v2272_v52 }
  0xb6   : > { %1546 = vmatprep.subr.bf16.mxu1 %v2191_v24 }
 0x104   : > { %v2324_v4 = vpop.permute.xlu0 %242 }
 0x105   : > { %vm735_vm0 = vcmp.lt.s32.totalorder %v2319_v53, %v2324_v4  ;;  %vm984_vm1 = vcmp.lt.s32.totalorder %v2321_v55, %v2324_v4  ;;  %vm1233_vm2 = vcmp.lt.s32.totalorder %v2326_v56, %v2324_v4  ;;  %vm486_vm3 = vcmp.lt.s32.totalorder %v485_v41, %v2324_v4  ;;  %v1025_v41 = vld [vmem:[#allocation7 + $0xe8] sm:$0xff] }
 0x169   : > { %v380_v61 = vpop.f32.mrb[0].mxu0 }
 0x16a   : > { %v456_v62 = vadd.f32 %v380_v61, %v245_v58  ;;  %v382_v63 = vpop.f32.mrb[1].mxu0 }
 0x16b   : > { %v457_v1 = vadd.f32 %v382_v63, %v246_v59  ;;  %v451_v7 = vpop.f32.mrb[0].mxu1 }
 0x16c   : > { %v1354_v3 = vmul.f32 -1.442695, %v456_v62  ;;  %v453_v12 = vpop.f32.mrb[1].mxu1  ;;  %v458_v14 = vadd.f32 %v451_v7, %v247_v6 }
 0x16d   : > { %v1355_v5 = vmul.f32 -1.442695, %v457_v1  ;;  %v459_v20 = vadd.f32 %v453_v12, %v248_v15 }
 0x16e   : > { %1730 = vpow2.f32 %v1354_v3  ;;  %v1356_v18 = vmul.f32 -1.442695, %v458_v14 }
 0x16f   : > { %1732 = vpow2.f32 %v1355_v5 }
 0x170   : > { %1734 = vpow2.f32 %v1356_v18 }
 0x171   : > { %1736 = vtanh.f32 %v459_v20 }
 0x178   : > { %v1731_v22 = vpop.eup %1730 }
 0x179   : > { %v1733_v23 = vpop.eup %1732  ;;  %v469_v25 = vadd.f32 1.0, %v1731_v22 }
 0x17a   : > { %v470_v26 = vadd.f32 1.0, %v1733_v23  ;;  %v1735_v31 = vpop.eup %1734 }
 0x17b   : > { %1738 = vrcp.f32 %v469_v25  ;;  %v1737_v33 = vpop.eup %1736  ;;  %v471_v40 = vadd.f32 1.0, %v1735_v31  ;;  %v1008_v31 = vld [vmem:[#allocation7 + $0x60] sm:$0xff] }
 0x17c   : > { %1740 = vrcp.f32 %v470_v26 }
 0x17d   : > { %1742 = vrcp.f32 %v471_v40  ;;  %v1021_v40 = vld [vmem:[#allocation7 + $0xc8] sm:$0xff] }
 0x185   : > { %v1739_v38 = vpop.eup %1738 }
 0x186   : > { %v1741_v46 = vpop.eup %1740  ;;  %v481_v49 = vmul.f32 %v1739_v38, %v1737_v33 }
 0x187   : > { %v480_v58 = vmul.f32 %v1741_v46, %v479_v37  ;;  %v1743_v62 = vpop.eup %1742  ;;  %v1589_v46 = vpack.c.bf16 %v1025_v41, %v1021_v40 }
 0x189   : > { %v482_v59 = vadd.f32 %v481_v49, %v480_v58  ;;  %v1020_v49 = vld [vmem:[#allocation7 + $0xc0] sm:$0xff] }
 0x18a   : > { %v1024_v58 = vld [vmem:[#allocation7 + $0xe0] sm:$0xff] }
 0x18b   : > { %1744 = vtanh.f32 %v482_v59  ;;  %v2340_v61 = vsel %vm486_vm3, %v482_v59, %v479_v37  ;;  %v1016_v37 = vld [vmem:[#allocation7 + $0xa0] sm:$0xff]  ;;  %v1591_v59 = vpack.c.bf16 %v1024_v58, %v1020_v49 }
 0x195   : > { %v1745_v63 = vpop.eup %1744 }
 0x196   : > { %v484_v1 = vmul.f32 %v1745_v63, %v1743_v62  ;;  %v1033_v62 = vld [vmem:[#allocation7 + $0x128] sm:$0xff] }
 0x198   : > { %v2343_v3 = vsel %vm486_vm3, %v484_v1, %v2269_v51  ;;  %v1028_v1 = vld [vmem:[#allocation7 + $0x100] sm:$0xff] }
 0x199   : > { %627 = vmatmul.mubr.f32.vlgmr.msra.gmra.mrb[2].mxu0 %v2343_v3  ;;  %698 = vmatmul.mubr.f32.vlgmr.msra.gmra.mrb[2].mxu1 %v2343_v3 }
 0x19a   : > { %1516 = vmatpush1.bf16.msra.mxu0 %v2180_v9  ;;  %1548 = vmatpush1.bf16.msra.mxu1 %v2193_v27  ;;  %v1357_v9 = vld [vmem:[%s2165_s10 + $0x20] sm:$0xff] }
 0x19b   : > { %1518 = vmatprep.subr.bf16.mxu0 %v2182_v10  ;;  %1550 = vmatprep.subr.bf16.mxu1 %v2203_v35  ;;  %v1358_v10 = vld [vmem:[%s2165_s10 + $0x28] sm:$0xff] }
 0x19c   : > { %875 = vmatprep.mubr.f32.mxu0 %v1972_v8  ;;  %946 = vmatprep.mubr.f32.mxu1 %v1972_v8 }
 0x19e   : > { %1520 = vmatpush1.bf16.msra.mxu0 %v2186_v16  ;;  %1552 = vmatpush1.bf16.msra.mxu1 %v2205_v39 }
 0x19f   : > { %1522 = vmatprep.subr.bf16.mxu0 %v2189_v19  ;;  %1554 = vmatprep.subr.bf16.mxu1 %v2211_v47 }
 0x1a2   : > { %1524 = vmatpush1.bf16.msra.mxu0 %v2196_v28  ;;  %1556 = vmatpush1.bf16.msra.mxu1 %v2217_v50 }
 0x1a3   : > { %1526 = vmatprep.subr.bf16.mxu0 %v2200_v32  ;;  %1558 = vmatprep.subr.bf16.mxu1 %v2220_v54 }
 0x1a6   : > { %1528 = vmatpush1.bf16.msra.mxu0 %v2209_v44  ;;  %1560 = vmatpush1.bf16.msra.mxu1 %v2229_v0 }
 0x1a7   : > { %1530 = vmatprep.subr.bf16.mxu0 %v2214_v48  ;;  %1562 = vmatprep.subr.bf16.mxu1 %v2232_v2 }
 0x1aa   : > { %1532 = vmatpush1.bf16.msra.mxu0 %v2223_v57  ;;  %1564 = vmatpush1.bf16.msra.mxu1 %v2241_v17 }
 0x1ab   : > { %1534 = vmatprep.subr.bf16.mxu0 %v2226_v60  ;;  %1566 = vmatprep.subr.bf16.mxu1 %v2244_v21 }
 0x1ae   : > { %1536 = vmatpush1.bf16.msra.mxu0 %v2235_v11  ;;  %1568 = vmatpush1.bf16.msra.mxu1 %v2253_v34  ;;  %v1359_v11 = vld [vmem:[%s2165_s10 + $0x30] sm:$0xff] }
 0x1af   : > { %1538 = vmatprep.subr.bf16.mxu0 %v2238_v13  ;;  %1570 = vmatprep.subr.bf16.mxu1 %v2256_v36 }
 0x1b2   : > { %1540 = vmatpush1.bf16.msra.mxu0 %v2247_v29  ;;  %1572 = vmatpush1.bf16.msra.mxu1 %v2263_v43  ;;  %v1360_v29 = vld [vmem:[%s2165_s10 + $0x38] sm:$0xff] }
 0x1b3   : > { %1542 = vmatprep.subr.bf16.mxu0 %v2250_v30  ;;  %1574 = vmatprep.subr.bf16.mxu1 %v2266_v45 }
 0x1b6   : > { %1544 = vmatpush1.bf16.msra.mxu0 %v2259_v42  ;;  %1576 = vmatpush1.bf16.msra.mxu1 %v2272_v52 }
 0x1b7   : > { %1610 = vmatprep.subr.bf16.mxu1 %v2191_v24 }
 0x26c   : > { %v628_v16 = vpop.f32.mrb[2].mxu0  ;;  %v699_v19 = vpop.f32.mrb[2].mxu1 }
 0x26d   : > { %v704_v28 = vadd.f32 %v1357_v9, %v628_v16  ;;  %v630_v32 = vpop.f32.mrb[3].mxu0  ;;  %v701_v44 = vpop.f32.mrb[3].mxu1  ;;  %v706_v13 = vadd.f32 %v1359_v11, %v699_v19  ;;  %v1041_v16 = vld [vmem:[#allocation7 + $0x168] sm:$0xff]  ;;  %v1044_v11 = vld [vmem:[#allocation7 + $0x180] sm:$0xff] }
 0x26e   : > { %v705_v48 = vadd.f32 %v1358_v10, %v630_v32  ;;  %v707_v30 = vadd.f32 %v1360_v29, %v701_v44  ;;  %v1037_v10 = vld [vmem:[#allocation7 + $0x148] sm:$0xff]  ;;  %v1040_v32 = vld [vmem:[#allocation7 + $0x160] sm:$0xff]  ;;  %v1046_v29 = vld [vmem:[#allocation7 + $0x190] sm:$0xff] }
 0x26f   : > { %v1361_v57 = vmul.f32 -1.442695, %v704_v28  ;;  %v1363_v42 = vmul.f32 -1.442695, %v706_v13  ;;  %v1597_v19 = vpack.c.bf16 %v1041_v16, %v1037_v10  ;;  %v1036_v28 = vld [vmem:[#allocation7 + $0x140] sm:$0xff]  ;;  %v1372_v16 = vld [vmem:[%s2165_s10 + $0x68] sm:$0xff] }
 0x270   : > { %v1362_v60 = vmul.f32 -1.442695, %v705_v48  ;;  %v1599_v44 = vpack.c.bf16 %v1040_v32, %v1036_v28  ;;  %v1045_v48 = vld [vmem:[#allocation7 + $0x188] sm:$0xff]  ;;  %v1048_v13 = vld [vmem:[#allocation7 + $0x1a0] sm:$0xff] }
 0x271   : > { %1746 = vpow2.f32 %v1361_v57  ;;  %v1049_v57 = vld [vmem:[#allocation7 + $0x1a8] sm:$0xff]  ;;  %v1371_v10 = vld [vmem:[%s2165_s10 + $0x60] sm:$0xff] }
 0x272   : > { %1748 = vpow2.f32 %v1362_v60  ;;  %v1601_v60 = vpack.c.bf16 %v1049_v57, %v1045_v48 }
 0x273   : > { %1750 = vtanh.f32 %v707_v30  ;;  %v1603_v30 = vpack.c.bf16 %v1048_v13, %v1044_v11  ;;  %v1373_v11 = vld [vmem:[%s2165_s10 + $0x70] sm:$0xff] }
 0x274   : > { %1752 = vpow2.f32 %v1363_v42  ;;  %v1050_v42 = vld [vmem:[#allocation7 + $0x1b0] sm:$0xff] }
 0x27b   : > { %v1747_v43 = vpop.eup %1746 }
 0x27c   : > { %v717_v45 = vadd.f32 1.0, %v1747_v43  ;;  %v1749_v24 = vpop.eup %1748  ;;  %v1635_v43 = vpack.c.bf16 %v1050_v42, %v1046_v29  ;;  %v1374_v29 = vld [vmem:[%s2165_s10 + $0x78] sm:$0xff] }
 0x27d   : > { %v718_v51 = vadd.f32 1.0, %v1749_v24  ;;  %v1751_v52 = vpop.eup %1750  ;;  %v1057_v24 = vld [vmem:[#allocation7 + $0x1e8] sm:$0xff] }
 0x27e   : > { %1754 = vrcp.f32 %v717_v45  ;;  %v1753_v5 = vpop.eup %1752  ;;  %v1053_v45 = vld [vmem:[#allocation7 + $0x1c8] sm:$0xff] }
 0x27f   : > { %1756 = vrcp.f32 %v718_v51  ;;  %v719_v14 = vadd.f32 1.0, %v1753_v5  ;;  %v1055_v51 = vld [vmem:[#allocation7 + $0x1d8] sm:$0xff] }
 0x280   : > { %v1059_v5 = vld [vmem:[#allocation7 + $0x1f8] sm:$0xff] }
 0x281   : > { %1758 = vrcp.f32 %v719_v14 }
 0x288   : > { %v1755_v6 = vpop.eup %1754 }
 0x289   : > { %v729_v7 = vmul.f32 %v1755_v6, %v1751_v52  ;;  %v1757_v12 = vpop.eup %1756  ;;  %v1605_v52 = vpack.c.bf16 %v1057_v24, %v1053_v45  ;;  %v1052_v6 = vld [vmem:[#allocation7 + $0x1c0] sm:$0xff] }
 0x28a   : > { %v728_v15 = vmul.f32 %v1757_v12, %v2340_v61  ;;  %v1637_v12 = vpack.c.bf16 %v1059_v5, %v1055_v51 }
 0x28b   : > { %v1759_v22 = vpop.eup %1758 }
 0x28c   : > { %v730_v18 = vadd.f32 %v729_v7, %v728_v15  ;;  %v1056_v7 = vld [vmem:[#allocation7 + $0x1e0] sm:$0xff]  ;;  %v1054_v15 = vld [vmem:[#allocation7 + $0x1d0] sm:$0xff] }
 0x28d   : > { %v1607_v14 = vpack.c.bf16 %v1056_v7, %v1052_v6 }
 0x28e   : > { %1760 = vtanh.f32 %v730_v18  ;;  %v2389_v20 = vsel %vm735_vm0, %v730_v18, %v2340_v61  ;;  %v1029_v61 = vld [vmem:[#allocation7 + $0x108] sm:$0xff]  ;;  %v1058_v18 = vld [vmem:[#allocation7 + $0x1f0] sm:$0xff] }
 0x28f   : > { %v1593_v63 = vpack.c.bf16 %v1033_v62, %v1029_v61 }
 0x298   : > { %v1761_v23 = vpop.eup %1760 }
 0x299   : > { %v732_v25 = vmul.f32 %v1761_v23, %v1759_v22  ;;  %v1639_v22 = vpack.c.bf16 %v1058_v18, %v1054_v15  ;;  %v1364_v23 = vld [vmem:[%s2165_s10 + $0x40] sm:$0xff] }
 0x29b   : > { %v2395_v26 = vsel %vm735_vm0, %v732_v25, %v2343_v3  ;;  %v1032_v3 = vld [vmem:[#allocation7 + $0x120] sm:$0xff]  ;;  %v1365_v25 = vld [vmem:[%s2165_s10 + $0x48] sm:$0xff] }
 0x29c   : > { %876 = vmatmul.mubr.f32.vlgmr.msra.gmra.mrb[4].mxu0 %v2395_v26  ;;  %947 = vmatmul.mubr.f32.vlgmr.msra.gmra.mrb[4].mxu1 %v2395_v26  ;;  %v1595_v9 = vpack.c.bf16 %v1032_v3, %v1028_v1 }
 0x29d   : > { %1612 = vmatpush1.bf16.msra.mxu1 %v2193_v27  ;;  %1124 = vmatprep.mubr.f32.mxu0 %v1972_v8  ;;  %v1001_v27 = vld [vmem:[#allocation7 + $0x28] sm:$0xff] }
 0x29e   : > { %1614 = vmatprep.subr.bf16.mxu1 %v2203_v35  ;;  %1195 = vmatprep.mubr.f32.mxu1 %v1972_v8  ;;  %v997_v8 = vld [vmem:[#allocation7 + $0x8] sm:$0xff] }
 0x29f   : > { %v1577_v35 = vpack.c.bf16 %v1001_v27, %v997_v8 }
 0x2a1   : > { %1616 = vmatpush1.bf16.msra.mxu1 %v2205_v39  ;;  %v996_v39 = vld [vmem:[#allocation7] sm:$0xff]  ;;  %1578 = vmatprep.subr.bf16.mxu0 %v1577_v35 }
 0x2a2   : > { %1618 = vmatprep.subr.bf16.mxu1 %v2211_v47  ;;  %v1000_v47 = vld [vmem:[#allocation7 + $0x20] sm:$0xff] }
 0x2a5   : > { %1620 = vmatpush1.bf16.msra.mxu1 %v2217_v50  ;;  %v1579_v50 = vpack.c.bf16 %v1000_v47, %v996_v39 }
 0x2a6   : > { %1622 = vmatprep.subr.bf16.mxu1 %v2220_v54  ;;  %v1005_v54 = vld [vmem:[#allocation7 + $0x48] sm:$0xff] }
 0x2a7   : > { %1580 = vmatpush1.bf16.msra.mxu0 %v1579_v50 }
 0x2a9   : > { %1624 = vmatpush1.bf16.msra.mxu1 %v2229_v0  ;;  %v1009_v0 = vld [vmem:[#allocation7 + $0x68] sm:$0xff] }
 0x2aa   : > { %1626 = vmatprep.subr.bf16.mxu1 %v2232_v2  ;;  %v1581_v53 = vpack.c.bf16 %v1009_v0, %v1005_v54  ;;  %v1004_v2 = vld [vmem:[#allocation7 + $0x40] sm:$0xff] }
 0x2ac   : > { %1582 = vmatprep.subr.bf16.mxu0 %v1581_v53  ;;  %v1366_v53 = vld [vmem:[%s2165_s10 + $0x50] sm:$0xff] }
 0x2ad   : > { %1628 = vmatpush1.bf16.msra.mxu1 %v2241_v17  ;;  %v1583_v17 = vpack.c.bf16 %v1008_v31, %v1004_v2  ;;  %v1367_v31 = vld [vmem:[%s2165_s10 + $0x58] sm:$0xff] }
 0x2ae   : > { %1630 = vmatprep.subr.bf16.mxu1 %v2244_v21  ;;  %v1013_v21 = vld [vmem:[#allocation7 + $0x88] sm:$0xff] }
 0x2af   : > { %1584 = vmatpush1.bf16.msra.mxu0 %v1583_v17 }
 0x2b1   : > { %1632 = vmatpush1.bf16.msra.mxu1 %v2253_v34  ;;  %v1017_v34 = vld [vmem:[#allocation7 + $0xa8] sm:$0xff] }
 0x2b2   : > { %1634 = vmatprep.subr.bf16.mxu1 %v2256_v36  ;;  %v1585_v33 = vpack.c.bf16 %v1017_v34, %v1013_v21  ;;  %v1012_v36 = vld [vmem:[#allocation7 + $0x80] sm:$0xff] }
 0x2b3   : > { %v1587_v38 = vpack.c.bf16 %v1016_v37, %v1012_v36 }
 0x2b4   : > { %1586 = vmatprep.subr.bf16.mxu0 %v1585_v33 }
 0x2b5   : > { %1588 = vmatpush1.bf16.msra.mxu0 %v1587_v38  ;;  %1636 = vmatpush1.bf16.msra.mxu1 %v1635_v43 }
 0x2b6   : > { %1590 = vmatprep.subr.bf16.mxu0 %v1589_v46  ;;  %1638 = vmatprep.subr.bf16.mxu1 %v1637_v12 }
 0x2b9   : > { %1592 = vmatpush1.bf16.msra.mxu0 %v1591_v59  ;;  %1640 = vmatpush1.bf16.msra.mxu1 %v1639_v22 }
 0x2ba   : > { %1594 = vmatprep.subr.bf16.mxu0 %v1593_v63 }
 0x2bd   : > { %1596 = vmatpush1.bf16.msra.mxu0 %v1595_v9 }
 0x2be   : > { %1598 = vmatprep.subr.bf16.mxu0 %v1597_v19 }
 0x2c1   : > { %1600 = vmatpush1.bf16.msra.mxu0 %v1599_v44 }
 0x2c2   : > { %1602 = vmatprep.subr.bf16.mxu0 %v1601_v60 }
 0x2c5   : > { %1604 = vmatpush1.bf16.msra.mxu0 %v1603_v30 }
 0x2c6   : > { %1606 = vmatprep.subr.bf16.mxu0 %v1605_v52 }
 0x2c9   : > { %1608 = vmatpush1.bf16.msra.mxu0 %v1607_v14 }
 0x36f   : > { %v877_v8 = vpop.f32.mrb[4].mxu0  ;;  %v948_v27 = vpop.f32.mrb[4].mxu1 }
 0x370   : > { %v953_v35 = vadd.f32 %v1364_v23, %v877_v8  ;;  %v879_v39 = vpop.f32.mrb[5].mxu0  ;;  %v950_v47 = vpop.f32.mrb[5].mxu1  ;;  %v955_v2 = vadd.f32 %v1366_v53, %v948_v27 }
 0x371   : > { %v954_v50 = vadd.f32 %v1365_v25, %v879_v39  ;;  %v956_v17 = vadd.f32 %v1367_v31, %v950_v47 }
 0x372   : > { %v1368_v54 = vmul.f32 -1.442695, %v953_v35  ;;  %v1370_v21 = vmul.f32 -1.442695, %v955_v2 }
 0x373   : > { %v1369_v0 = vmul.f32 -1.442695, %v954_v50 }
 0x374   : > { %1762 = vpow2.f32 %v1368_v54 }
 0x375   : > { %1764 = vpow2.f32 %v1369_v0 }
 0x376   : > { %1766 = vtanh.f32 %v956_v17 }
 0x377   : > { %1768 = vpow2.f32 %v1370_v21 }
 0x37e   : > { %v1763_v34 = vpop.eup %1762 }
 0x37f   : > { %v966_v33 = vadd.f32 1.0, %v1763_v34  ;;  %v1765_v36 = vpop.eup %1764 }
 0x380   : > { %v967_v37 = vadd.f32 1.0, %v1765_v36  ;;  %v1767_v38 = vpop.eup %1766 }
 0x381   : > { %1770 = vrcp.f32 %v966_v33  ;;  %v1769_v40 = vpop.eup %1768 }
 0x382   : > { %1772 = vrcp.f32 %v967_v37  ;;  %v968_v58 = vadd.f32 1.0, %v1769_v40 }
 0x384   : > { %1774 = vrcp.f32 %v968_v58 }
 0x38b   : > { %v1771_v41 = vpop.eup %1770 }
 0x38c   : > { %v978_v46 = vmul.f32 %v1771_v41, %v1767_v38  ;;  %v1773_v49 = vpop.eup %1772 }
 0x38d   : > { %v977_v59 = vmul.f32 %v1773_v49, %v2389_v20 }
 0x38e   : > { %v1775_v63 = vpop.eup %1774 }
 0x38f   : > { %v979_v61 = vadd.f32 %v978_v46, %v977_v59 }
 0x391   : > { %1776 = vtanh.f32 %v979_v61  ;;  %v985_v62 = vsel %vm984_vm1, %v979_v61, %v2389_v20 }
 0x39b   : > { %v1777_v1 = vpop.eup %1776 }
 0x39c   : > { %v981_v3 = vmul.f32 %v1777_v1, %v1775_v63 }
 0x39e   : > { %v988_v9 = vsel %vm984_vm1, %v981_v3, %v2395_v26 }
 0x39f   : > { %1125 = vmatmul.mubr.f32.vlgmr.msra.gmra.mrb[6].mxu0 %v988_v9  ;;  %1196 = vmatmul.mubr.f32.vlgmr.msra.gmra.mrb[6].mxu1 %v988_v9 }
 0x472   : > { %v1126_v19 = vpop.f32.mrb[6].mxu0  ;;  %v1197_v28 = vpop.f32.mrb[6].mxu1 }
 0x473   : > { %v1202_v32 = vadd.f32 %v1371_v10, %v1126_v19  ;;  %v1128_v44 = vpop.f32.mrb[7].mxu0  ;;  %v1199_v48 = vpop.f32.mrb[7].mxu1  ;;  %v1204_v13 = vadd.f32 %v1373_v11, %v1197_v28 }
 0x474   : > { %v1203_v20 = vadd.f32 %v1372_v16, %v1128_v44  ;;  %v1205_v55 = vadd.f32 %v1374_v29, %v1199_v48 }
 0x475   : > { %v1375_v57 = vmul.f32 -1.442695, %v1202_v32  ;;  %v1377_v26 = vmul.f32 -1.442695, %v1204_v13 }
 0x476   : > { %v1376_v60 = vmul.f32 -1.442695, %v1203_v20 }
 0x477   : > { %1778 = vpow2.f32 %v1375_v57 }
 0x478   : > { %1780 = vpow2.f32 %v1376_v60 }
 0x479   : > { %1782 = vtanh.f32 %v1205_v55 }
 0x47a   : > { %1784 = vpow2.f32 %v1377_v26 }
 0x481   : > { %v1779_v30 = vpop.eup %1778 }
 0x482   : > { %v1215_v42 = vadd.f32 1.0, %v1779_v30  ;;  %v1781_v43 = vpop.eup %1780 }
 0x483   : > { %v1216_v45 = vadd.f32 1.0, %v1781_v43  ;;  %v1783_v24 = vpop.eup %1782 }
 0x484   : > { %1786 = vrcp.f32 %v1215_v42  ;;  %v1785_v51 = vpop.eup %1784 }
 0x485   : > { %1788 = vrcp.f32 %v1216_v45  ;;  %v1217_v7 = vadd.f32 1.0, %v1785_v51 }
 0x487   : > { %1790 = vrcp.f32 %v1217_v7 }
 0x48e   : > { %v1787_v52 = vpop.eup %1786 }
 0x48f   : > { %v1227_v5 = vmul.f32 %v1787_v52, %v1783_v24  ;;  %v1789_v6 = vpop.eup %1788 }
 0x490   : > { %v1226_v12 = vmul.f32 %v1789_v6, %v985_v62 }
 0x491   : > { %v1791_v18 = vpop.eup %1790 }
 0x492   : > { %v1228_v14 = vadd.f32 %v1227_v5, %v1226_v12 }
 0x494   : > { %1792 = vtanh.f32 %v1228_v14  ;;  %v1234_v15 = vsel %vm1233_vm2, %v1228_v14, %v985_v62 }
 0x495   : > { %1235 = vst [vmem:[#allocation3] sm:$0xff] %v1234_v15 }
 0x49c   : > { %1242 = sbr.rel (%p1378_p9) target bundleno = 1195 (0x4ab), region = 52 }
 0x49e   : > { %v1793_v22 = vpop.eup %1792 }
 0x49f   : > { %v1230_v23 = vmul.f32 %v1793_v22, %v1791_v18 }
 0x4a1   : > { %v1237_v25 = vsel %vm1233_vm2, %v1230_v23, %v988_v9 }
 0x4a2   : > { %1238 = vst [vmem:[#allocation2] sm:$0xff] %v1237_v25 }
 0x4a9   : > { %v1243_v8 = vld [vmem:[#allocation2] sm:$0xff] }
 0x4aa   : > { %1244 = vst [vmem:[#allocation10] sm:$0xff] %v1243_v8 }
 0x4ab PF: > { %p2439_p1 = scmp.eq.s32.totalorder %s1339_s18, 1  ;;  %s1974_s27 = smov [#allocation10]  }
 0x4ac   : > { %s1254_s29 = sshll.u32 %s1974_s27, 4  ;;  %s1255_s29 = int_to_ptr.vmem [resolvable:$true] %s1254_s29 }
 0x4ad   : > { %s1880_s30 = scalar_lea.vmem %s1255_s29, 128  ;;  %p1887_p10 = scmp.lt.s32.totalorder %s1255_s29, %s1255_s29 }
 0x4ae   : > { %p1881_p4 = scmp.ne.s32.totalorder %s1255_s29, %s1880_s30  ;;  %p1888_p11 = scmp.lt.s32.totalorder %s1880_s30, %s1880_s30 }
 0x4b0   : > { %p1882_p5 = pnand %p1881_p4, %p2439_p1  ;;  %p1889_p13 = por %p1888_p11, %p1887_p10 }
 0x4b2   : > { %p1883_p8 = pneg %p1882_p5 }
 0x4b4   : > { %p1890_p2 = pnand %p1889_p13, %p1883_p8 }
 0x4b6   : > { %1893 = shalt.err (!%p1890_p2)
}
 0x4b7   : > { %s1894_s18 = scalar_lea.hbm %s2486_s3, 128 }
 0x4b8   : > { %p1895_p3 = scmp.ne.s32.totalorder %s2486_s3, %s1894_s18  ;;  %p1900_p6 = scmp.lt.u32.totalorder %s1894_s18, %s2486_s3 }
 0x4ba   : > { %p1896_p12 = pnand %p1895_p3, %p2439_p1 }
 0x4bc   : > { %p1897_p0 = pneg %p1896_p12 }
 0x4be   : > { %p1902_p7 = pnand %p1900_p6, %p1897_p0 }
 0x4c0   : > { %1905 = shalt.err (!%p1902_p7)
}
 0x4c1   : > { %1652 = dma.vmem_to_hbm [thread:$0]  (%p2439_p1), %s1255_s29, 128, %s2486_s3, [#allocation6]  }
 0x4c2   : > { %1939 = dma.done.wait (%p2439_p1), [#allocation6], 128  }
 0x4c3   : > { %1941 = vsyncadd (%p2439_p1), [#allocation6], 4294967168 }
 0x4c4 PF: > { %s18_s17 = sadd.s32 1, %s1964_s17   ;;  %s2500_s12 = smov %s1948_s13 }
 0x4c5   : > { %p15_p9 = scmp.ge.s32.totalorder %s18_s17, 4   ;;  %s2501_s13 = smov %s1952_s14 }
 0x4c6   : > { %s2502_s14 = smov %s2116_s22  ;;  %s2503_s15 = smov %s1960_s16 }
 0x4c7   : > { %s2504_s16 = smov %s2506_s6  ;;  %17 = sbr.rel (!%p15_p9) target bundleno = 6 (0x6), region = 90 }
 0x4ce   :  { %1267 = vsyncpa [#allocation5], 1 }
 0x4cf   :  { %1269 = vsyncpa [#allocation5 + $0x1], 1 }
 0x4d0   :  { %1270 = vsyncpa [#allocation8], 1 }
 0x4d1   :  { %1271 = vsyncpa [#allocation6], 1 }
 0x4d2   :  { %1273 = vsyncpa [#allocation6 + $0x1], 1 }

</bundles_post_ra>
